<compile_context>
chip_gen: v7x
topology: tpu7x:2x2x1
jax: 0.10.0
libtpu: 0.0.40
codegen_flags: <defaults>
</compile_context>

<pallas_src>
import functools

import jax
import jax.numpy as jnp
from jax.experimental import pallas as pl
from jax.experimental.pallas import tpu as pltpu


def _round_up(n: int, m: int) -> int:
    return ((n + m - 1) // m) * m


def _mlp_kernel(x_ref, w1_ref, b1_ref, w2_ref, b2_ref, w3_ref, b3_ref, o_ref):
    # Batch-on-lanes layout: x_ref is (3, TB); activations (32, TB); output (1, TB).
    x = x_ref[...]                                                    # (3, TB)

    # Layer 1: Linear(3, 32) + Tanh   ->  (32,3) @ (3,TB) + b1
    h1 = jnp.dot(w1_ref[...], x, preferred_element_type=jnp.float32)  # (32, TB)
    h1 = jnp.tanh(h1 + b1_ref[...])

    # Layer 2: Linear(32, 32) + Tanh  ->  (32,32) @ (32,TB) + b2
    h2 = jnp.dot(w2_ref[...], h1, preferred_element_type=jnp.float32)  # (32, TB)
    h2 = jnp.tanh(h2 + b2_ref[...])

    # Layer 3: Linear(32, 1) + Sigmoid. 1-wide output -> VPU multiply + sublane
    # reduction (avoids a near-empty M=1 MXU matmul / result pop).
    h3 = jnp.sum(h2 * w3_ref[...], axis=0, keepdims=True) + b3_ref[...]  # (1, TB)
    o_ref[...] = jax.nn.sigmoid(h3).astype(o_ref.dtype)


@functools.partial(jax.jit, static_argnames=("tb_max",))
def policy_nn_v2_forward(x, params, tb_max: int = 2048):
    """x: (B, 3) float32  ->  (B, 1) float32 (sigmoid output)."""
    B = x.shape[0]
    tb = min(tb_max, _round_up(B, 128))    # lane tile (multiple of 128)
    bp = _round_up(B, tb)                  # padded batch (multiple of tb)
    grid = (bp // tb,)

    # One-time layout change in the wrapper: batch on lanes, zero-pad to tile.
    xt = jnp.zeros((3, bp), jnp.float32).at[:, :B].set(x.T.astype(jnp.float32))

    w1t, b1 = params["w1t"], params["b1"]  # (32, 3), (32, 1)
    w2t, b2 = params["w2t"], params["b2"]  # (32, 32), (32, 1)
    w3, b3 = params["w3"], params["b3"]    # (32, 1),  (1, 1)

    # Constant index map -> weights/biases fetched once, kept resident in VMEM.
    const = lambda shape: pl.BlockSpec(shape, lambda i: (0, 0))

    out_t = pl.pallas_call(
        _mlp_kernel,
        out_shape=jax.ShapeDtypeStruct((1, bp), jnp.float32),
        grid=grid,
        in_specs=[
            pl.BlockSpec((3, tb), lambda i: (0, i)),   # x tile (lane-dense)
            const(w1t.shape), const(b1.shape),
            const(w2t.shape), const(b2.shape),
            const(w3.shape), const(b3.shape),
        ],
        out_specs=pl.BlockSpec((1, tb), lambda i: (0, i)),  # lane-dense output tile
        compiler_params=pltpu.CompilerParams(
            dimension_semantics=("parallel",)),             # megacore on v7x
    )(xt, w1t, b1, w2t, b2, w3, b3)

    return out_t[:, :B].T                                   # (B, 1)


def init_params(key):
    """PyTorch nn.Linear-style init. Weights stored in kernel layout:
       w1t = W1 (out,in) = (32,3), w2t = W2 = (32,32), w3 = W3^T = (32,1),
       biases as column vectors for lane-broadcast inside the kernel."""
    k1, k2, k3, k4, k5, k6 = jax.random.split(key, 6)

    def uniform(k, shape, fan_in):
        bound = 1.0 / jnp.sqrt(fan_in)
        return jax.random.uniform(k, shape, jnp.float32, -bound, bound)

    return {
        "w1t": uniform(k1, (32, 3), 3.0),
        "b1":  uniform(k2, (32, 1), 3.0),
        "w2t": uniform(k3, (32, 32), 32.0),
        "b2":  uniform(k4, (32, 1), 32.0),
        "w3":  uniform(k5, (32, 1), 32.0),
        "b3":  uniform(k6, (1, 1), 32.0),
    }


def reference_forward(x, p):
    h1 = jnp.tanh(x @ p["w1t"].T + p["b1"].T)
    h2 = jnp.tanh(h1 @ p["w2t"].T + p["b2"].T)
    return jax.nn.sigmoid(h2 @ p["w3"] + p["b3"])


if __name__ == "__main__":
    key = jax.random.PRNGKey(0)
    kx, kp = jax.random.split(key)
    params = init_params(kp)

    # Small batch; input_size = 1 + 1 + 1 = 3 features per agent.
    B = 8
    x = jax.random.normal(kx, (B, 3), dtype=jnp.float32)
    out = jax.block_until_ready(policy_nn_v2_forward(x, params))
    ref = reference_forward(x, params)
    assert out.shape == (B, 1)
    assert jnp.allclose(out, ref, atol=1e-5, rtol=1e-5), (out, ref)

    # Exercise multi-tile grid + padding path with a small tile size.
    B2 = 300
    x2 = jax.random.normal(kx, (B2, 3), dtype=jnp.float32)
    out2 = jax.block_until_ready(policy_nn_v2_forward(x2, params, tb_max=128))
    ref2 = reference_forward(x2, params)
    assert out2.shape == (B2, 1)
    assert jnp.allclose(out2, ref2, atol=1e-5, rtol=1e-5), (out2, ref2)

    print("KERNEL_OK")
</pallas_src>

<mosaic_0001>
module attributes {stable_mosaic.version = 11 : i64} {
  func.func @_mlp_kernel(%arg0: i32, %arg1: memref<3x128xf32, #tpu.memory_space<vmem>>, %arg2: memref<32x3xf32, #tpu.memory_space<vmem>>, %arg3: memref<32x1xf32, #tpu.memory_space<vmem>>, %arg4: memref<32x32xf32, #tpu.memory_space<vmem>>, %arg5: memref<32x1xf32, #tpu.memory_space<vmem>>, %arg6: memref<32x1xf32, #tpu.memory_space<vmem>>, %arg7: memref<1x1xf32, #tpu.memory_space<vmem>>, %arg8: memref<1x128xf32, #tpu.memory_space<vmem>>) attributes {dimension_semantics = [#tpu.dimension_semantics<parallel>], iteration_bounds = array<i64: 1>, scalar_prefetch = 0 : i64, scratch_operands = 0 : i64, tpu.core_type = #tpu.core_type<tc>, window_params = [{transform_indices = @transform_0, window_bounds = array<i64: 3, 128>}, {pipeline_mode = #tpu.pipeline_mode<synchronous>, transform_indices = @transform_1, window_bounds = array<i64: 32, 3>}, {pipeline_mode = #tpu.pipeline_mode<synchronous>, transform_indices = @transform_2, window_bounds = array<i64: 32, 1>}, {pipeline_mode = #tpu.pipeline_mode<synchronous>, transform_indices = @transform_3, window_bounds = array<i64: 32, 32>}, {pipeline_mode = #tpu.pipeline_mode<synchronous>, transform_indices = @transform_4, window_bounds = array<i64: 32, 1>}, {pipeline_mode = #tpu.pipeline_mode<synchronous>, transform_indices = @transform_5, window_bounds = array<i64: 32, 1>}, {pipeline_mode = #tpu.pipeline_mode<synchronous>, transform_indices = @transform_6, window_bounds = array<i64: 1, 1>}, {transform_indices = @transform_7, window_bounds = array<i64: 1, 128>}]} {
    %c0 = arith.constant 0 : index
    %c0_0 = arith.constant 0 : index
    %0 = vector.load %arg1[%c0, %c0_0] : memref<3x128xf32, #tpu.memory_space<vmem>>, vector<3x128xf32>
    %c0_1 = arith.constant 0 : index
    %c0_2 = arith.constant 0 : index
    %1 = vector.load %arg2[%c0_1, %c0_2] : memref<32x3xf32, #tpu.memory_space<vmem>>, vector<32x3xf32>
    %cst = arith.constant dense<0.000000e+00> : vector<32x128xf32>
    %2 = tpu.matmul %1, %0, %cst {dimension_numbers = #tpu.dot_dimension_numbers<[1], [0], [0], [1], [0, 0, 1, 1], [], []>} : vector<32x3xf32>, vector<3x128xf32>, vector<32x128xf32> -> vector<32x128xf32>
    %c0_3 = arith.constant 0 : index
    %c0_4 = arith.constant 0 : index
    %3 = vector.load %arg3[%c0_3, %c0_4] : memref<32x1xf32, #tpu.memory_space<vmem>>, vector<32x1xf32>
    %4 = vector.broadcast %3 : vector<32x1xf32> to vector<32x128xf32>
    %5 = arith.addf %2, %4 : vector<32x128xf32>
    %6 = math.tanh %5 : vector<32x128xf32>
    %c0_5 = arith.constant 0 : index
    %c0_6 = arith.constant 0 : index
    %7 = vector.load %arg4[%c0_5, %c0_6] : memref<32x32xf32, #tpu.memory_space<vmem>>, vector<32x32xf32>
    %cst_7 = arith.constant dense<0.000000e+00> : vector<32x128xf32>
    %8 = tpu.matmul %7, %6, %cst_7 {dimension_numbers = #tpu.dot_dimension_numbers<[1], [0], [0], [1], [0, 0, 1, 1], [], []>} : vector<32x32xf32>, vector<32x128xf32>, vector<32x128xf32> -> vector<32x128xf32>
    %c0_8 = arith.constant 0 : index
    %c0_9 = arith.constant 0 : index
    %9 = vector.load %arg5[%c0_8, %c0_9] : memref<32x1xf32, #tpu.memory_space<vmem>>, vector<32x1xf32>
    %10 = vector.broadcast %9 : vector<32x1xf32> to vector<32x128xf32>
    %11 = arith.addf %8, %10 : vector<32x128xf32>
    %12 = math.tanh %11 : vector<32x128xf32>
    %c0_10 = arith.constant 0 : index
    %c0_11 = arith.constant 0 : index
    %13 = vector.load %arg6[%c0_10, %c0_11] : memref<32x1xf32, #tpu.memory_space<vmem>>, vector<32x1xf32>
    %14 = vector.broadcast %13 : vector<32x1xf32> to vector<32x128xf32>
    %15 = arith.mulf %12, %14 : vector<32x128xf32>
    %cst_12 = arith.constant dense<0.000000e+00> : vector<128xf32>
    %16 = vector.multi_reduction <add>, %15, %cst_12 [0] : vector<32x128xf32> to vector<128xf32>
    %17 = vector.shape_cast %16 : vector<128xf32> to vector<1x128xf32>
    %c0_13 = arith.constant 0 : index
    %c0_14 = arith.constant 0 : index
    %18 = vector.load %arg7[%c0_13, %c0_14] : memref<1x1xf32, #tpu.memory_space<vmem>>, vector<1x1xf32>
    %19 = vector.broadcast %18 : vector<1x1xf32> to vector<1x128xf32>
    %20 = arith.addf %17, %19 : vector<1x128xf32>
    %21 = arith.negf %20 : vector<1x128xf32>
    %22 = math.exp %21 : vector<1x128xf32>
    %cst_15 = arith.constant 1.000000e+00 : f32
    %23 = vector.broadcast %cst_15 : f32 to vector<1x128xf32>
    %24 = arith.addf %23, %22 : vector<1x128xf32>
    %25 = arith.divf %23, %24 : vector<1x128xf32>
    %c0_16 = arith.constant 0 : index
    %c0_17 = arith.constant 0 : index
    %26 = vector.load %arg8[%c0_16, %c0_17] : memref<1x128xf32, #tpu.memory_space<vmem>>, vector<1x128xf32>
    tpu.vector_store %arg8[%c0_16, %c0_17], %25 {strides = array<i32>} : memref<1x128xf32, #tpu.memory_space<vmem>>, vector<1x128xf32>,
    return
  }
  func.func @transform_0(%arg0: i32) -> (i32, i32) {
    %c0_i32 = arith.constant 0 : i32
    %c0_i32_0 = arith.constant 0 : i32
    return %c0_i32, %arg0 : i32, i32
  }
  func.func @transform_1(%arg0: i32) -> (i32, i32) {
    %c0_i32 = arith.constant 0 : i32
    %c0_i32_0 = arith.constant 0 : i32
    %c0_i32_1 = arith.constant 0 : i32
    return %c0_i32, %c0_i32_0 : i32, i32
  }
  func.func @transform_2(%arg0: i32) -> (i32, i32) {
    %c0_i32 = arith.constant 0 : i32
    %c0_i32_0 = arith.constant 0 : i32
    %c0_i32_1 = arith.constant 0 : i32
    return %c0_i32, %c0_i32_0 : i32, i32
  }
  func.func @transform_3(%arg0: i32) -> (i32, i32) {
    %c0_i32 = arith.constant 0 : i32
    %c0_i32_0 = arith.constant 0 : i32
    %c0_i32_1 = arith.constant 0 : i32
    return %c0_i32, %c0_i32_0 : i32, i32
  }
  func.func @transform_4(%arg0: i32) -> (i32, i32) {
    %c0_i32 = arith.constant 0 : i32
    %c0_i32_0 = arith.constant 0 : i32
    %c0_i32_1 = arith.constant 0 : i32
    return %c0_i32, %c0_i32_0 : i32, i32
  }
  func.func @transform_5(%arg0: i32) -> (i32, i32) {
    %c0_i32 = arith.constant 0 : i32
    %c0_i32_0 = arith.constant 0 : i32
    %c0_i32_1 = arith.constant 0 : i32
    return %c0_i32, %c0_i32_0 : i32, i32
  }
  func.func @transform_6(%arg0: i32) -> (i32, i32) {
    %c0_i32 = arith.constant 0 : i32
    %c0_i32_0 = arith.constant 0 : i32
    %c0_i32_1 = arith.constant 0 : i32
    return %c0_i32, %c0_i32_0 : i32, i32
  }
  func.func @transform_7(%arg0: i32) -> (i32, i32) {
    %c0_i32 = arith.constant 0 : i32
    %c0_i32_0 = arith.constant 0 : i32
    return %c0_i32, %arg0 : i32, i32
  }
}

</mosaic_0001>

<bundles_post_ra>
// kernel: policy_nn_v2_forward.1
= control target key start
LH: loop header
LB: loop body
LE: loop exit
PB: predicated region body
PF: predicated region fallthrough
CT: control target
= control target key end

     0   :  { %vm70_vm0 = vcmask 1042432   ;;  %vm57_vm1 = vcmask 23552   ;;  %v432_v3 = vmov 0   ;;  %vm191_vm2 = vcmask 261120   ;;  %s552_s0 = inlined_call_operand.vmem [shape: f32[3,128], index: 0, kind: input, shape index: {}]   ;;  %s553_s1 = inlined_call_operand.vmem [shape: f32[32,3], index: 1, kind: input, shape index: {}]   ;;  %s554_s2 = inlined_call_operand.vmem [shape: f32[32,1], index: 2, kind: input, shape index: {}]   ;;  %s555_s6 = inlined_call_operand.<no memory space> [shape: f32[1,1], index: 6, kind: input, shape index: {}]   ;;  %s556_s4 = inlined_call_operand.vmem [shape: f32[32,1], index: 4, kind: input, shape index: {}]   ;;  %s557_s5 = inlined_call_operand.vmem [shape: f32[32,1], index: 5, kind: input, shape index: {}]   ;;  %s558_s3 = inlined_call_operand.vmem [shape: f32[32,32], index: 3, kind: input, shape index: {}]   ;;  %s559_s7 = inlined_call_operand.vmem [shape: f32[1,128], index: 7, kind: output, shape index: {}]  }
   0x1   :  { %v28_v0 = vld [vmem:[%s552_s0] sm:$0x7]  ;;  %v30_v2 = vld [vmem:[%s553_s1 + $0x8] sm:$0xff]  ;;  %410 = vset.pattern.permute.xlu0 %v432_v3  ;;  %411 = vset.pattern.permute.xlu1 %v432_v3  ;;  %v12_v4 = vstv %s555_s6  ;;  %v31_v5 = vld [vmem:[%s553_s1 + $0x10] sm:$0xff] }
   0x2   :  { %v29_v1 = vld [vmem:[%s553_s1] sm:$0xff]  ;;  %375 = vmatprep.subr.msk.mxu0 %vm70_vm0, %v28_v0  ;;  %13 = vst [vmem:[#allocation2] sm:$0x1] %v12_v4  ;;  %v35_v7 = vld [vmem:[%s554_s2 + $0x10] sm:$0xff]  ;;  %v34_v8 = vld [vmem:[%s554_s2 + $0x8] sm:$0xff]  ;;  %v336_v4 = vlaneseq }
   0x3   :  { %377 = vmatprep.mubr.msk.f32.mxu0 %vm57_vm1, %v29_v1  ;;  %v33_v6 = vld [vmem:[%s554_s2] sm:$0xff]  ;;  %376 = vmatpush3.msk.msra.mxu0 %vm70_vm0, %v28_v0  ;;  %v32_v9 = vld [vmem:[%s553_s1 + $0x18] sm:$0xff]  ;;  %v168_v12 = vld [vmem:[%s556_s4 + $0x8] sm:$0xff] }
   0x4   :  { %39 = vperm.xlu0 %410, %v33_v6   ;;  %378 = vmatmul.mubr.msk.f32.vlgmr.msra.gmra.mrb[0].mxu0 %vm57_vm1, %v30_v2  ;;  %v36_v10 = vld [vmem:[%s554_s2 + $0x18] sm:$0xff]  ;;  %v167_v11 = vld [vmem:[%s556_s4] sm:$0xff]  ;;  %v169_v13 = vld [vmem:[%s556_s4 + $0x10] sm:$0xff] }
   0x5   :  { %49 = vperm.xlu1 %411, %v35_v7   ;;  %380 = vmatprep.mubr.msk.f32.mxu0 %vm57_vm1, %v31_v5  ;;  %v170_v14 = vld [vmem:[%s556_s4 + $0x18] sm:$0xff]  ;;  %v293_v15 = vld [vmem:[%s557_s5] sm:$0xff]  ;;  %v294_v16 = vld [vmem:[%s557_s5 + $0x8] sm:$0xff]  ;;  %v337_v7 = vshrl.u32 %v336_v4, 7 }
   0x6   :  { %v295_v17 = vld [vmem:[%s557_s5 + $0x10] sm:$0xff]  ;;  %v296_v18 = vld [vmem:[%s557_s5 + $0x18] sm:$0xff]  ;;  %v163_v20 = vld [vmem:[%s558_s3] sm:$0xff] }
   0x7   :  { %v165_v21 = vld [vmem:[%s558_s3 + $0x10] sm:$0xff]  ;;  %v164_v40 = vld [vmem:[%s558_s3 + $0x8] sm:$0xff]  ;;  %v166_v41 = vld [vmem:[%s558_s3 + $0x18] sm:$0xff] }
   0x8   :  { %44 = vperm.xlu0 %410, %v34_v8   ;;  %381 = vmatmul.mubr.msk.f32.gmra.mrb[2].mxu0 %vm57_vm1, %v32_v9 }
   0x9   :  { %54 = vperm.xlu1 %411, %v36_v10   ;;  %v330_v19 = vld [vmem:[#allocation2] sm:$0x1]  ;;  %391 = vmatprep.mubr.msk.f32.mxu0 %vm191_vm2, %v163_v20  ;;  %v338_v10 = vsub.s32 0, %v337_v7 }
   0xa   :  { %394 = vmatprep.mubr.msk.f32.mxu1 %vm191_vm2, %v165_v21 }
   0xc   :  { %173 = vperm.xlu0 %410, %v167_v11  }
   0xd   :  { %178 = vperm.xlu1 %411, %v168_v12  }
  0x10   :  { %183 = vperm.xlu0 %410, %v169_v13  }
  0x11   :  { %188 = vperm.xlu1 %411, %v170_v14  }
  0x14   :  { %299 = vperm.xlu0 %410, %v293_v15  }
  0x15   :  { %304 = vperm.xlu1 %411, %v294_v16  }
  0x18   :  { %309 = vperm.xlu0 %410, %v295_v17  }
  0x19   :  { %314 = vperm.xlu1 %411, %v296_v18  }
  0x1c   :  { %333 = vperm.xlu0 %410, %v330_v19  }
  0x83   :  { %v40_v22 = vpop.permute.xlu0 %39 }
  0x84   :  { %v50_v23 = vpop.permute.xlu1 %49 }
  0x87   :  { %v45_v24 = vpop.permute.xlu0 %44 }
  0x88   :  { %v55_v29 = vpop.permute.xlu1 %54 }
  0x8b   :  { %v174_v42 = vpop.permute.xlu0 %173 }
  0x8c   :  { %v179_v43 = vpop.permute.xlu1 %178 }
  0x8f   :  { %v184_v44 = vpop.permute.xlu0 %183 }
  0x90   :  { %v189_v50 = vpop.permute.xlu1 %188 }
  0x93   :  { %v300_v54 = vpop.permute.xlu0 %299 }
  0x94   :  { %v305_v56 = vpop.permute.xlu1 %304 }
  0x97   :  { %v310_v62 = vpop.permute.xlu0 %309 }
  0x98   :  { %v315_v1 = vpop.permute.xlu1 %314 }
  0x9b   :  { %v334_v12 = vpop.permute.xlu0 %333 }
  0x9c   :  { %v339_v14 = vrot.slane %v334_v12, %v338_v10 }
  0xd7   :  { %v379_v25 = vpop.f32.mrb[0].mxu0 }
  0xd8   :  { %v146_v26 = vadd.f32 %v379_v25, %v45_v24  ;;  %v140_v27 = vpop.f32.mrb[1].mxu0 }
  0xd9   :  { %v141_v28 = vadd.f32 %v140_v27, %v40_v22 }
  0xda   :  { %412 = vtanh.f32 %v146_v26 }
  0xdb   :  { %414 = vtanh.f32 %v141_v28  ;;  %v382_v30 = vpop.f32.mrb[2].mxu0 }
  0xdc   :  { %v156_v31 = vadd.f32 %v382_v30, %v55_v29  ;;  %v150_v32 = vpop.f32.mrb[3].mxu0 }
  0xdd   :  { %v151_v33 = vadd.f32 %v150_v32, %v50_v23 }
  0xde   :  { %416 = vtanh.f32 %v156_v31 }
  0xdf   :  { %418 = vtanh.f32 %v151_v33 }
  0xe4   :  { %v413_v34 = vpop.eup %412 }
  0xe5   :  { %v415_v35 = vpop.eup %414 }
  0xe6   :  { %v397_v36 = vpack.c.bf16 %v413_v34, %v415_v35 }
  0xe8   :  { %v417_v37 = vpop.eup %416  ;;  %398 = vmatprep.subr.bf16.mxu0 %v397_v36  ;;  %405 = vmatprep.subr.bf16.mxu1 %v397_v36 }
  0xe9   :  { %v419_v38 = vpop.eup %418  ;;  %400 = vmatpush3.bf16.msra.mxu0 %v397_v36  ;;  %407 = vmatpush3.bf16.msra.mxu1 %v397_v36 }
  0xea   :  { %v401_v39 = vpack.c.bf16 %v417_v37, %v419_v38 }
  0xec   :  { %402 = vmatprep.subr.bf16.mxu0 %v401_v39  ;;  %406 = vmatprep.subr.bf16.mxu1 %v401_v39 }
  0xed   :  { %404 = vmatpush3.bf16.msra.mxu0 %v401_v39  ;;  %408 = vmatpush3.bf16.msra.mxu1 %v401_v39 }
  0xf0   :  { %392 = vmatmul.mubr.msk.f32.vlgmr.msra.gmra.mrb[4].mxu0 %vm191_vm2, %v164_v40  ;;  %395 = vmatmul.mubr.msk.f32.vlgmr.msra.gmra.mrb[0].mxu1 %vm191_vm2, %v166_v41 }
 0x1c3   :  { %v393_v45 = vpop.f32.mrb[4].mxu0  ;;  %v396_v46 = vpop.f32.mrb[0].mxu1 }
 0x1c4   :  { %v276_v47 = vadd.f32 %v393_v45, %v179_v43  ;;  %v270_v48 = vpop.f32.mrb[5].mxu0  ;;  %v280_v49 = vpop.f32.mrb[1].mxu1  ;;  %v286_v53 = vadd.f32 %v396_v46, %v189_v50 }
 0x1c5   :  { %v271_v51 = vadd.f32 %v270_v48, %v174_v42  ;;  %v281_v52 = vadd.f32 %v280_v49, %v184_v44 }
 0x1c6   :  { %420 = vtanh.f32 %v276_v47 }
 0x1c7   :  { %422 = vtanh.f32 %v271_v51 }
 0x1c8   :  { %424 = vtanh.f32 %v281_v52 }
 0x1c9   :  { %426 = vtanh.f32 %v286_v53 }
 0x1d0   :  { %v421_v55 = vpop.eup %420 }
 0x1d1   :  { %v318_v57 = vmul.f32 %v421_v55, %v305_v56  ;;  %v423_v58 = vpop.eup %422 }
 0x1d2   :  { %v425_v59 = vpop.eup %424  ;;  %v317_v60 = vmul.f32 %v423_v58, %v300_v54 }
 0x1d3   :  { %v427_v61 = vpop.eup %426  ;;  %v319_v0 = vmul.f32 %v425_v59, %v310_v62 }
 0x1d4   :  { %v321_v63 = vadd.f32 %v318_v57, %v317_v60  ;;  %v320_v2 = vmul.f32 %v427_v61, %v315_v1 }
 0x1d6   :  { %v322_v3 = vadd.f32 %v321_v63, %v319_v0 }
 0x1d8   :  { %v323_v5 = vadd.f32 %v322_v3, %v320_v2 }
 0x1da   :  { %v324_v6 = vrot.slane %v323_v5, 4 }
 0x1dc   :  { %v325_v8 = vadd.f32 %v324_v6, %v323_v5 }
 0x1de   :  { %v326_v9 = vrot.slane %v325_v8, 2 }
 0x1e0   :  { %v327_v11 = vadd.f32 %v326_v9, %v325_v8 }
 0x1e2   :  { %v328_v13 = vrot.slane %v327_v11, 1 }
 0x1e4   :  { %v329_v15 = vadd.f32 %v328_v13, %v327_v11 }
 0x1e6   :  { %v340_v16 = vadd.f32 %v339_v14, %v329_v15 }
 0x1e8   :  { %v361_v17 = vmul.f32 -1.442695, %v340_v16 }
 0x1ea   :  { %428 = vpow2.f32 %v361_v17 }
 0x1f4   :  { %v429_v18 = vpop.eup %428 }
 0x1f5   :  { %v344_v19 = vadd.f32 1.0, %v429_v18 }
 0x1f7   :  { %430 = vrcp.f32 %v344_v19 }
 0x201   :  { %v431_v20 = vpop.eup %430 }
 0x202   :  { %347 = vst [vmem:[%s559_s7] sm:$0x1] %v431_v20 }

</bundles_post_ra>
